<compile_context>
chip_gen: v5e
topology: v5e:2x2
jax: 0.10.0
libtpu: 0.0.40
codegen_flags: <defaults>
</compile_context>

<pallas_src>
import math

import jax
import jax.numpy as jnp
from jax.experimental import pallas as pl
from jax.experimental.pallas import tpu as pltpu

_LANE = 128
_SUBLANE = 8
_MAX_TILE_N = 2048            # upper bound on rows per grid step
_VMEM_FALLBACK = 64 << 20     # assume smallest per-TC VMEM (v7x) if query fails


def _round_up(x, m):
    return ((x + m - 1) // m) * m


def _vmem_budget():
    """Returns (physical per-core VMEM bytes, usable budget with headroom)."""
    try:
        cap = int(pltpu.get_tpu_info().vmem_capacity_bytes)
    except Exception:  # query unavailable -> be conservative (v7x-sized)
        cap = _VMEM_FALLBACK
    budget = max(int(cap * 0.75), cap - (8 << 20))
    return cap, budget


def _logreg_kernel(x_ref, w_ref, b_ref, o_ref):
    # x_ref: [tile_n, ft_in], w_ref: [ft_in, tile_nc], b_ref: [1, tile_nc]
    x = x_ref[...]
    w = w_ref[...]
    if x.dtype != w.dtype:
        # bf16-weight path: cast activations in-kernel (hidden under the DMA),
        # never in the wrapper (that would be an extra full HBM pass over x).
        x = x.astype(w.dtype)
    acc = jnp.dot(x, w, preferred_element_type=jnp.float32)
    o_ref[...] = (acc + b_ref[...].astype(jnp.float32)).astype(o_ref.dtype)


def prepare_logreg_params(weight, bias, weight_dtype=None):
    """One-time parameter prep (cache the result; do NOT call per forward).

    weight: [nb_classes, ft_in], bias: [nb_classes].
    Returns (w_t [ft_in, nc_pad], b [1, nc_pad]) with the class dim zero-padded
    to a multiple of 128 (lane-dense MXU output / unmasked stores).  The
    feature (contraction) dim is intentionally NOT padded so activations never
    need a wrapper-side pad.  weight_dtype=jnp.bfloat16 halves weight DMA and
    VMEM on v6e/v7x (accumulation stays f32).
    """
    nb_classes, ft_in = weight.shape
    nc_pad = _round_up(nb_classes, _LANE)
    w_dtype = weight.dtype if weight_dtype is None else weight_dtype
    w_t = jnp.zeros((ft_in, nc_pad), dtype=w_dtype)
    w_t = w_t.at[:, :nb_classes].set(weight.T.astype(w_dtype))
    b = jnp.zeros((1, nc_pad), dtype=jnp.float32)
    b = b.at[0, :nb_classes].set(bias.astype(jnp.float32))
    return w_t, b


def logreg_forward(seq, w_t, b, nb_classes, slice_output=True):
    """seq: [..., ft_in]; (w_t, b) from prepare_logreg_params.

    Returns [..., nb_classes] in seq.dtype (same semantics as nn.Linear).
    Set slice_output=False to receive the 128-padded class dim (saves one full
    XLA copy pass over the output when the consumer can mask instead).
    """
    orig_shape = seq.shape
    if seq.ndim != 2:
        seq = seq.reshape(-1, orig_shape[-1])
    n, ft_in = seq.shape
    ft_in_w, nc_pad = w_t.shape
    if ft_in != ft_in_w:
        raise ValueError(f"feature dim mismatch: x has {ft_in}, W^T has {ft_in_w}")

    out_dtype = seq.dtype
    x_bytes = jnp.dtype(seq.dtype).itemsize
    w_bytes = jnp.dtype(w_t.dtype).itemsize
    o_bytes = jnp.dtype(out_dtype).itemsize

    vmem_cap, budget = _vmem_budget()

    # ---- class tiling: keep the (double-buffered) weight tile <= ~45% budget.
    w_budget = int(budget * 0.45)
    if 2 * ft_in * nc_pad * w_bytes <= w_budget:
        tile_nc = nc_pad
    else:
        tile_nc = max(_LANE, (w_budget // (2 * ft_in * w_bytes)) // _LANE * _LANE)
        # TODO(synk): for extreme ft_in where even a 128-wide weight tile blows
        # the budget, add a K-reduction grid axis with a VMEM f32 accumulator.
    grid_nc = pl.cdiv(nc_pad, tile_nc)

    # ---- row tiling from what's left (x + out tiles are double-buffered).
    rem = budget - 2 * ft_in * tile_nc * w_bytes - 2 * tile_nc * 4 - (1 << 20)
    per_row = 2 * (ft_in * x_bytes + tile_nc * o_bytes)
    tile_cap = (max(rem, per_row * _SUBLANE) // per_row) // _SUBLANE * _SUBLANE
    tile_cap = max(_SUBLANE, min(_MAX_TILE_N, tile_cap))

    num_row_tiles = max(1, pl.cdiv(n, tile_cap))
    if num_row_tiles == 1 and n > 256:
        num_row_tiles = 2          # let both v7x TensorCores get work
    tile_n = min(tile_cap,
                 max(_SUBLANE, _round_up(pl.cdiv(n, num_row_tiles), _SUBLANE)))
    grid_n = pl.cdiv(n, tile_n)    # last row block may be partial (masked DMA)

    vmem_need = (2 * tile_n * ft_in * x_bytes      # x tiles (double-buffered)
                 + 2 * tile_n * tile_nc * o_bytes  # out tiles
                 + 2 * ft_in * tile_nc * w_bytes   # weight tile
                 + 2 * tile_nc * 4                 # bias
                 + (2 << 20))                      # headroom
    vmem_limit = int(min(max(vmem_need, 8 << 20), vmem_cap))

    cost = pl.CostEstimate(
        flops=2 * n * ft_in * nc_pad,
        transcendentals=0,
        bytes_accessed=int(n * ft_in * x_bytes
                           + grid_n * ft_in * nc_pad * w_bytes
                           + n * nc_pad * o_bytes),
    )

    out = pl.pallas_call(
        _logreg_kernel,
        out_shape=jax.ShapeDtypeStruct((n, nc_pad), out_dtype),
        grid=(grid_n, grid_nc),
        in_specs=[
            pl.BlockSpec((tile_n, ft_in), lambda i, j: (i, 0)),   # x: row tiles
            pl.BlockSpec((ft_in, tile_nc), lambda i, j: (0, j)),  # W^T: class tiles
            pl.BlockSpec((1, tile_nc), lambda i, j: (0, j)),      # bias
        ],
        out_specs=pl.BlockSpec((tile_n, tile_nc), lambda i, j: (i, j)),
        compiler_params=pltpu.CompilerParams(
            dimension_semantics=("parallel", "parallel"),
            vmem_limit_bytes=vmem_limit,
        ),
        cost_estimate=cost,
    )(seq, w_t, b)

    if slice_output and nc_pad != nb_classes:
        out = out[:, :nb_classes]
    if len(orig_shape) != 2:
        out = out.reshape(*orig_shape[:-1], out.shape[-1])
    return out


def init_logreg_params(key, ft_in, nb_classes):
    """xavier_uniform_ weight, zero bias (matches the PyTorch module init)."""
    limit = math.sqrt(6.0 / (ft_in + nb_classes))
    weight = jax.random.uniform(
        key, (nb_classes, ft_in), minval=-limit, maxval=limit, dtype=jnp.float32
    )
    bias = jnp.zeros((nb_classes,), dtype=jnp.float32)
    return weight, bias


if __name__ == "__main__":
    key = jax.random.PRNGKey(0)
    k_x, k_w, k_x2, k_w2 = jax.random.split(key, 4)

    # --- small, exact-tile case (matches the module's forward) ---
    N, FT_IN, NB_CLASSES = 8, 32, 16
    seq = jax.random.normal(k_x, (N, FT_IN), dtype=jnp.float32)
    weight, bias = init_logreg_params(k_w, FT_IN, NB_CLASSES)
    w_t, b = prepare_logreg_params(weight, bias)          # prep once, reuse
    out = jax.block_until_ready(logreg_forward(seq, w_t, b, NB_CLASSES))
    ref = seq @ weight.T + bias
    assert out.shape == (N, NB_CLASSES)
    assert jnp.allclose(out, ref, atol=1e-5, rtol=1e-5)

    # --- ragged case (partial row block, padded class dim sliced off) ---
    N2, FT_IN2, NB_CLASSES2 = 13, 96, 10
    seq2 = jax.random.normal(k_x2, (N2, FT_IN2), dtype=jnp.float32)
    weight2, bias2 = init_logreg_params(k_w2, FT_IN2, NB_CLASSES2)
    w_t2, b2 = prepare_logreg_params(weight2, bias2)
    out2 = jax.block_until_ready(logreg_forward(seq2, w_t2, b2, NB_CLASSES2))
    ref2 = seq2 @ weight2.T + bias2
    assert out2.shape == (N2, NB_CLASSES2)
    assert jnp.allclose(out2, ref2, atol=1e-4, rtol=1e-4)

    print("KERNEL_OK")
</pallas_src>

<mosaic_0001>
module attributes {stable_mosaic.version = 11 : i64} {
  func.func @_logreg_kernel(%arg0: i32, %arg1: i32, %arg2: memref<8x32xf32, #tpu.memory_space<vmem>>, %arg3: memref<32x128xf32, #tpu.memory_space<vmem>>, %arg4: memref<1x128xf32, #tpu.memory_space<vmem>>, %arg5: memref<8x128xf32, #tpu.memory_space<vmem>>) attributes {dimension_semantics = [#tpu.dimension_semantics<parallel>, #tpu.dimension_semantics<parallel>], iteration_bounds = array<i64: 1, 1>, scalar_prefetch = 0 : i64, scratch_operands = 0 : i64, tpu.core_type = #tpu.core_type<tc>, window_params = [{transform_indices = @transform_0, window_bounds = array<i64: 8, 32>}, {transform_indices = @transform_1, window_bounds = array<i64: 32, 128>}, {transform_indices = @transform_2, window_bounds = array<i64: 1, 128>}, {transform_indices = @transform_3, window_bounds = array<i64: 8, 128>}]} {
    %c0 = arith.constant 0 : index
    %c0_0 = arith.constant 0 : index
    %0 = vector.load %arg2[%c0, %c0_0] : memref<8x32xf32, #tpu.memory_space<vmem>>, vector<8x32xf32>
    %c0_1 = arith.constant 0 : index
    %c0_2 = arith.constant 0 : index
    %1 = vector.load %arg3[%c0_1, %c0_2] : memref<32x128xf32, #tpu.memory_space<vmem>>, vector<32x128xf32>
    %cst = arith.constant dense<0.000000e+00> : vector<8x128xf32>
    %2 = tpu.matmul %0, %1, %cst {dimension_numbers = #tpu.dot_dimension_numbers<[1], [0], [0], [1], [0, 0, 1, 1], [], []>} : vector<8x32xf32>, vector<32x128xf32>, vector<8x128xf32> -> vector<8x128xf32>
    %c0_3 = arith.constant 0 : index
    %c0_4 = arith.constant 0 : index
    %3 = vector.load %arg4[%c0_3, %c0_4] : memref<1x128xf32, #tpu.memory_space<vmem>>, vector<1x128xf32>
    %4 = vector.broadcast %3 : vector<1x128xf32> to vector<8x128xf32>
    %5 = arith.addf %2, %4 : vector<8x128xf32>
    %c0_5 = arith.constant 0 : index
    %c0_6 = arith.constant 0 : index
    %6 = vector.load %arg5[%c0_5, %c0_6] : memref<8x128xf32, #tpu.memory_space<vmem>>, vector<8x128xf32>
    tpu.vector_store %arg5[%c0_5, %c0_6], %5 {strides = array<i32>} : memref<8x128xf32, #tpu.memory_space<vmem>>, vector<8x128xf32>,
    return
  }
  func.func @transform_0(%arg0: i32, %arg1: i32) -> (i32, i32) {
    %c0_i32 = arith.constant 0 : i32
    %c0_i32_0 = arith.constant 0 : i32
    return %arg0, %c0_i32 : i32, i32
  }
  func.func @transform_1(%arg0: i32, %arg1: i32) -> (i32, i32) {
    %c0_i32 = arith.constant 0 : i32
    %c0_i32_0 = arith.constant 0 : i32
    return %c0_i32, %arg1 : i32, i32
  }
  func.func @transform_2(%arg0: i32, %arg1: i32) -> (i32, i32) {
    %c0_i32 = arith.constant 0 : i32
    %c0_i32_0 = arith.constant 0 : i32
    return %c0_i32, %arg1 : i32, i32
  }
  func.func @transform_3(%arg0: i32, %arg1: i32) -> (i32, i32) {
    %c0_i32 = arith.constant 0 : i32
    return %arg0, %arg1 : i32, i32
  }
}

</mosaic_0001>

<bundles_post_ra>
// kernel: tpu_custom_call.1
= control target key start
LH: loop header
LB: loop body
LE: loop exit
PB: predicated region body
PF: predicated region fallthrough
CT: control target
= control target key end

     0   :  { %8 = vsyncpa [#allocation3], 0  ;;  %s219_s0 = inlined_call_operand.hbm [shape: f32[8,32], index: 0, kind: input, shape index: {}]   ;;  %s220_s1 = inlined_call_operand.hbm [shape: f32[32,128], index: 1, kind: input, shape index: {}]   ;;  %s221_s2 = inlined_call_operand.vmem [shape: f32[1,128], index: 2, kind: input, shape index: {}]   ;;  %s222_s3 = inlined_call_operand.hbm [shape: f32[8,128], index: 3, kind: output, shape index: {}]  }
   0x1   :  { %9 = vsyncpa [#allocation6], 0 }
   0x2   :  { %10 = vsyncpa [#allocation4], 0  ;;  %s16_s14 = sshll.u32 %s219_s0, 4  ;;  %s182_s15 = smov [#allocation2]   ;;  %s17_s14 = int_to_ptr.hbm [resolvable:$true] %s16_s14 }
   0x3   :  { %s18_s16 = sshll.u32 %s182_s15, 4  ;;  %s26_s19 = sshll.u32 %s220_s1, 4  ;;  %s19_s16 = int_to_ptr.vmem [resolvable:$true] %s18_s16  ;;  %s27_s19 = int_to_ptr.hbm [resolvable:$true] %s26_s19 }
   0x4   :  { %21 = dma.hbm_to_vmem [thread:$0]  %s17_s14, 128, %s19_s16, [#allocation3]  }
   0x5   :  { %s183_s20 = smov [#allocation5]   ;;  %s184_s22 = smov 128  }
   0x6   :  { %s28_s21 = sshll.u32 %s183_s20, 4  ;;  %s185_s23 = smov 8   ;;  %s29_s21 = int_to_ptr.vmem [resolvable:$true] %s28_s21 }
   0x7   :  { %34 = dma.hbm_to_vmem [thread:$0]  %s27_s19, 512, %s29_s21, [#allocation6], %s184_s22, %s184_s22, %s185_s23  }
   0x8   :  { %176 = dma.done.wait [#allocation3], 128  }
   0x9   :  { %177 = vsyncadd [#allocation3], 4294967168 }
   0xa   :  { %178 = dma.done.wait [#allocation6], 512  }
   0xb   :  { %179 = vsyncadd [#allocation6], 4294966784  ;;  %v49_v0 = vld [vmem:[#allocation5 + $0x18] sm:$0xff]  ;;  %v48_v1 = vld [vmem:[#allocation5 + $0x10] sm:$0xff]  ;;  %vm54_vm0 = vcmask 261120   ;;  %s186_s24 = smov [#allocation7]  }
   0xc   :  { %70 = vmatpush.msra.mxu0 %v49_v0  ;;  %v47_v2 = vld [vmem:[#allocation5 + $0x8] sm:$0xff]  ;;  %v46_v3 = vld [vmem:[#allocation5] sm:$0xff]  ;;  %v45_v4 = vld [vmem:[#allocation2] sm:$0xff]  ;;  %s84_s25 = sshll.u32 %s186_s24, 4  ;;  %s86_s28 = sshll.u32 %s222_s3, 4  ;;  %s85_s25 = int_to_ptr.vmem [resolvable:$true] %s84_s25  ;;  %s87_s28 = int_to_ptr.hbm [resolvable:$true] %s86_s28 }
   0xd   :  { %v103_v5 = vld [vmem:[%s221_s2] ss:$0 sm:$0xff] }
   0xe   :  { %71 = vmatpush.msra.mxu0 %v48_v1 }
  0x10   :  { %72 = vmatpush.msra.mxu0 %v47_v2 }
  0x12   :  { %73 = vmatpush.msra.mxu0 %v46_v3 }
  0x13   :  { %97 = vmatmul.msk.f32.vlgmr.msra.gmra.mxu0 %vm54_vm0, %v45_v4 }
  0x90   :  { %v75_v6 = vpop.f32.mrf.mxu0 }
  0x91   :  { %v76_v7 = vadd.f32 %v103_v5, %v75_v6 }
  0x93   :  { %78 = vst [vmem:[#allocation7] sm:$0xff] %v76_v7 }
  0x94   :  { %89 = dma.vmem_to_hbm [thread:$0]  %s85_s25, 128, %s87_s28, [#allocation4]  }
  0x95   :  { %180 = dma.done.wait [#allocation4], 128  }
  0x96   :  { %181 = vsyncadd [#allocation4], 4294967168 }
  0x97   :  { %94 = vsyncpa [#allocation3], 1 }
  0x98   :  { %95 = vsyncpa [#allocation6], 1 }
  0x99   :  { %96 = vsyncpa [#allocation4], 1 }

</bundles_post_ra>
